<compile_context>
chip_gen: v6e
topology: v6e:2x2x1
jax: 0.10.0
libtpu: 0.0.40
codegen_flags: <defaults>
</compile_context>

<pallas_src>
import jax
import jax.numpy as jnp
import numpy as np
from jax.experimental import pallas as pl
from jax.experimental.pallas import tpu as pltpu

KSIZE = 5
PAD = 2
STRIDE = 2
EDGE = KSIZE - 1 - PAD          # effective conv padding of the transposed conv
BN_EPS = 1e-5


# ------------------------------- fused kernel -------------------------------
def fused_decoder_kernel(x_ref, wup_ref, w12_ref, bn_ref, o_ref, pad_ref):
    """Whole Decoder_block in one kernel invocation.

    x_ref   : (N, Ci, L_dil)   stride-2 zero-inserted input (undilated edge pad
                               and segment layout are done here, in VMEM)
    wup_ref : (K, Co, Ci)      upsample weights, one (Co, Ci) matrix per tap
                               (already channel-transposed and tap-flipped)
    w12_ref : (2K, Co, Co)     conv1 taps [0..K-1], conv2 taps [K..2K-1]
    bn_ref  : (Co, 4)          packed (gamma1, beta1, gamma2, beta2)
    o_ref   : (Co, total)      lane-dense output slab (unpacked in the wrapper)
    pad_ref : (Cmax, N*SEG)    VMEM scratch shared by all three stages
    """
    n, ci, l_dil = x_ref.shape
    co, total = o_ref.shape
    k_taps = wup_ref.shape[0]
    l_up = l_dil                            # (L-1)*2+1 == 2L-1 == L_up (pad=2)
    seg = l_up + 2 * PAD                    # per-batch padded segment length
    inv_cnt = 1.0 / float(n * l_up)

    # Hoisted full-shape validity mask: within each per-batch segment only the
    # first l_up lanes are real conv outputs; the rest straddle batch/pad
    # boundaries.  Built once at (Co, total) and reused by every masked pass.
    lane = jax.lax.broadcasted_iota(jnp.int32, (co, total), 1)
    valid = (lane % seg) < l_up

    # ---- build dilated + edge-padded + batch-folded input entirely in VMEM
    pad_ref[...] = jnp.zeros_like(pad_ref)
    for b in range(n):                      # static N, tiny contiguous copies
        s0 = b * seg + EDGE
        pad_ref[:ci, s0:s0 + l_dil] = x_ref[b]

    def conv(rows, w_ref, w_base):
        # K accumulated MXU dots; the tap shift lives in the *read* offset of
        # the scratch (no im2col concatenate, no relayout of a (K*C, total)
        # stack).  Per-tap weight slabs are first-axis (tile-aligned) slices.
        acc = jnp.dot(w_ref[w_base], pad_ref[:rows, 0:total],
                      preferred_element_type=jnp.float32)
        for k in range(1, k_taps):
            acc += jnp.dot(w_ref[w_base + k], pad_ref[:rows, k:k + total],
                           preferred_element_type=jnp.float32)
        return acc

    def stash(y):
        # Masked store back into the shared scratch; the zeros written at the
        # invalid lanes are exactly the per-segment PAD zeros the next conv
        # needs, and the untouched head/tail lanes stay zero from the init.
        pad_ref[:co, PAD:PAD + total] = jnp.where(valid, y, 0.0)

    def bn_relu(y, g, beta):
        # Training-mode BN fused to one scale/shift: a single masked pass
        # yields sum and sum-of-squares, then y*scale + shift, then ReLU.
        ym = jnp.where(valid, y, 0.0)
        s1 = jnp.sum(ym, axis=1, keepdims=True)
        s2 = jnp.sum(ym * ym, axis=1, keepdims=True)
        mean = s1 * inv_cnt
        var = s2 * inv_cnt - mean * mean
        scale = g * jax.lax.rsqrt(var + BN_EPS)
        shift = beta - mean * scale
        return jnp.maximum(y * scale + shift, 0.0)

    bn = bn_ref[...]
    g1, b1 = bn[:, 0:1], bn[:, 1:2]
    g2, b2 = bn[:, 2:3], bn[:, 3:4]

    # --- upsample: ConvTranspose1d == conv over the dilated input with the
    #     flipped, channel-transposed kernel (intermediate never leaves VMEM)
    stash(conv(ci, wup_ref, 0))

    # --- conv1 -> bn1 -> relu
    stash(bn_relu(conv(co, w12_ref, 0), g1, b1))

    # --- conv2 -> bn2 -> relu : one lane-dense, lane-0-aligned store.
    # Invalid lanes are never read by the wrapper, so no output masking.
    o_ref[...] = bn_relu(conv(co, w12_ref, k_taps), g2, b2)


# ------------------------------ host-side glue -------------------------------
def prepare_params(params):
    """Hoisted, once-per-parameter-set weight preprocessing."""
    w_up, w1, w2 = params["w_up"], params["w1"], params["w2"]
    # ConvTranspose1d(Ci,Co,K): effective conv tap j is w_up[i, o, K-1-j]
    # transposed to (Co, Ci).
    wup_taps = jnp.transpose(w_up[:, :, ::-1], (2, 1, 0))          # (K, Co, Ci)
    w1_taps = jnp.transpose(w1, (2, 0, 1))                         # (K, Co, Co)
    w2_taps = jnp.transpose(w2, (2, 0, 1))                         # (K, Co, Co)
    w12_taps = jnp.concatenate([w1_taps, w2_taps], axis=0)         # (2K, Co, Co)
    bn_ab = jnp.stack([params["g1"].reshape(-1), params["b1"].reshape(-1),
                       params["g2"].reshape(-1), params["b2"].reshape(-1)],
                      axis=1)                                      # (Co, 4)
    return {"wup_taps": wup_taps, "w12_taps": w12_taps, "bn_ab": bn_ab}


def _full_spec(shape):
    return pl.BlockSpec(shape, lambda i: (0,) * len(shape))


def decoder_block_forward(x, prep):
    """Pallas implementation of Decoder_block.forward (BN in training mode)."""
    n, ci, length = x.shape
    co = prep["wup_taps"].shape[1]
    l_up = (length - 1) * STRIDE - 2 * PAD + KSIZE      # = 2*length - 1
    l_dil = (length - 1) * STRIDE + 1                   # = 2*length - 1
    assert l_up == l_dil and EDGE == PAD, "layout assumes K=5, pad=2, stride=2"
    seg = l_up + 2 * PAD
    total = (n - 1) * seg + l_up
    c_scr = max(ci, co)

    # Only the stride-2 zero insertion stays in XLA (one fused scatter); edge
    # padding, transpose and per-batch segment layout happen inside the kernel.
    x_dil = jnp.zeros((n, ci, l_dil), jnp.float32).at[:, :, ::STRIDE].set(
        x.astype(jnp.float32))

    out2d = pl.pallas_call(
        fused_decoder_kernel,
        out_shape=jax.ShapeDtypeStruct((co, total), jnp.float32),
        grid=(1,),
        in_specs=[_full_spec(x_dil.shape),
                  _full_spec(prep["wup_taps"].shape),
                  _full_spec(prep["w12_taps"].shape),
                  _full_spec(prep["bn_ab"].shape)],
        out_specs=_full_spec((co, total)),
        scratch_shapes=[pltpu.VMEM((c_scr, n * seg), jnp.float32)],
        compiler_params=pltpu.CompilerParams(
            dimension_semantics=("arbitrary",)),
    )(x_dil, prep["wup_taps"], prep["w12_taps"], prep["bn_ab"])

    # Unpack the lane-dense (Co, total) slab -> (N, Co, L_up) in the wrapper.
    return jnp.stack([out2d[:, b * seg:b * seg + l_up] for b in range(n)],
                     axis=0)


# ------------------------------ pure-JAX reference ---------------------------
def ref_forward(x, params):
    dn = ("NCH", "OIH", "NCH")
    w_up_t = jnp.transpose(params["w_up"], (1, 0, 2))[:, :, ::-1]
    up = jax.lax.conv_general_dilated(
        x, w_up_t, window_strides=(1,), padding=[(KSIZE - 1 - PAD,) * 2],
        lhs_dilation=(STRIDE,), dimension_numbers=dn)

    def conv(h, w):
        return jax.lax.conv_general_dilated(
            h, w, window_strides=(1,), padding=[(PAD, PAD)],
            dimension_numbers=dn)

    def bn_relu(h, g, b):
        m = jnp.mean(h, axis=(0, 2), keepdims=True)
        v = jnp.mean((h - m) ** 2, axis=(0, 2), keepdims=True)
        hn = (h - m) * jax.lax.rsqrt(v + BN_EPS)
        hn = hn * g.reshape(1, -1, 1) + b.reshape(1, -1, 1)
        return jnp.maximum(hn, 0.0)

    h = bn_relu(conv(up, params["w1"]), params["g1"], params["b1"])
    return bn_relu(conv(h, params["w2"]), params["g2"], params["b2"])


# ----------------------------------- main ------------------------------------
if __name__ == "__main__":
    key = jax.random.PRNGKey(0)
    ks = jax.random.split(key, 8)
    N, C_IN, C_OUT, L = 2, 8, 8, 16
    x = jax.random.normal(ks[0], (N, C_IN, L), jnp.float32)
    params = {
        "w_up": 0.1 * jax.random.normal(ks[1], (C_IN, C_OUT, KSIZE), jnp.float32),
        "w1":   0.1 * jax.random.normal(ks[2], (C_OUT, C_OUT, KSIZE), jnp.float32),
        "w2":   0.1 * jax.random.normal(ks[3], (C_OUT, C_OUT, KSIZE), jnp.float32),
        "g1": 1.0 + 0.1 * jax.random.normal(ks[4], (C_OUT, 1), jnp.float32),
        "b1":       0.1 * jax.random.normal(ks[5], (C_OUT, 1), jnp.float32),
        "g2": 1.0 + 0.1 * jax.random.normal(ks[6], (C_OUT, 1), jnp.float32),
        "b2":       0.1 * jax.random.normal(ks[7], (C_OUT, 1), jnp.float32),
    }

    prep = jax.tree_util.tree_map(jax.block_until_ready, prepare_params(params))
    fwd = jax.jit(decoder_block_forward)
    out = jax.block_until_ready(fwd(x, prep))
    assert out.shape == (N, C_OUT, 2 * L - 1), out.shape

    ref = jax.block_until_ready(ref_forward(x, params))
    np.testing.assert_allclose(np.asarray(out), np.asarray(ref),
                               rtol=1e-4, atol=1e-4)
    print("KERNEL_OK")
</pallas_src>

<mosaic_0001>
module attributes {stable_mosaic.version = 11 : i64} {
  func.func @fused_decoder_kernel(%arg0: i32, %arg1: memref<2x8x31xf32, #tpu.memory_space<vmem>>, %arg2: memref<5x8x8xf32, #tpu.memory_space<vmem>>, %arg3: memref<10x8x8xf32, #tpu.memory_space<vmem>>, %arg4: memref<8x4xf32, #tpu.memory_space<vmem>>, %arg5: memref<8x66xf32, #tpu.memory_space<vmem>>, %arg6: memref<8x70xf32, #tpu.memory_space<vmem>>) attributes {dimension_semantics = [#tpu.dimension_semantics<arbitrary>], iteration_bounds = array<i64: 1>, scalar_prefetch = 0 : i64, scratch_operands = 1 : i64, tpu.core_type = #tpu.core_type<tc>, window_params = [{pipeline_mode = #tpu.pipeline_mode<synchronous>, transform_indices = @transform_0, window_bounds = array<i64: 2, 8, 31>}, {pipeline_mode = #tpu.pipeline_mode<synchronous>, transform_indices = @transform_1, window_bounds = array<i64: 5, 8, 8>}, {pipeline_mode = #tpu.pipeline_mode<synchronous>, transform_indices = @transform_2, window_bounds = array<i64: 10, 8, 8>}, {pipeline_mode = #tpu.pipeline_mode<synchronous>, transform_indices = @transform_3, window_bounds = array<i64: 8, 4>}, {pipeline_mode = #tpu.pipeline_mode<synchronous>, transform_indices = @transform_4, window_bounds = array<i64: 8, 66>}]} {
    %0 = tpu.iota {dimensions = array<i32: 1>} : vector<8x66xi32>
    %c35_i32 = arith.constant 35 : i32
    %c0_i32 = arith.constant 0 : i32
    %1 = arith.cmpi eq, %c35_i32, %c0_i32 : i32
    %c1_i32 = arith.constant 1 : i32
    %2 = arith.select %1, %c1_i32, %c35_i32 : i32
    %3 = vector.broadcast %2 : i32 to vector<8x66xi32>
    %4 = arith.remsi %0, %3 : vector<8x66xi32>
    %c0_i32_0 = arith.constant 0 : i32
    %5 = vector.broadcast %c0_i32_0 : i32 to vector<8x66xi32>
    %6 = arith.cmpi ne, %4, %5 : vector<8x66xi32>
    %c0_i32_1 = arith.constant 0 : i32
    %7 = vector.broadcast %c0_i32_1 : i32 to vector<8x66xi32>
    %8 = arith.cmpi slt, %4, %7 : vector<8x66xi32>
    %c0_i32_2 = arith.constant 0 : i32
    %9 = arith.cmpi slt, %2, %c0_i32_2 : i32
    %10 = vector.broadcast %9 : i1 to vector<8x66xi1>
    %11 = vector.broadcast %10 : vector<8x66xi1> to vector<8x66xi1>
    %12 = arith.xori %8, %11 : vector<8x66xi1>
    %13 = arith.andi %12, %6 : vector<8x66xi1>
    %14 = vector.broadcast %2 : i32 to vector<8x66xi32>
    %15 = arith.addi %4, %14 : vector<8x66xi32>
    %16 = arith.select %13, %15, %4 : vector<8x66xi1>, vector<8x66xi32>
    %c31_i32 = arith.constant 31 : i32
    %17 = vector.broadcast %c31_i32 : i32 to vector<8x66xi32>
    %18 = arith.cmpi slt, %16, %17 : vector<8x66xi32>
    %cst = arith.constant 0.000000e+00 : f32
    %19 = vector.broadcast %cst : f32 to vector<8x70xf32>
    %c0 = arith.constant 0 : index
    %c0_3 = arith.constant 0 : index
    %20 = vector.load %arg6[%c0, %c0_3] : memref<8x70xf32, #tpu.memory_space<vmem>>, vector<8x70xf32>
    tpu.vector_store %arg6[%c0, %c0_3], %19 {strides = array<i32>} : memref<8x70xf32, #tpu.memory_space<vmem>>, vector<8x70xf32>,
    %c0_4 = arith.constant 0 : index
    %c0_5 = arith.constant 0 : index
    %c0_6 = arith.constant 0 : index
    %21 = vector.load %arg1[%c0_4, %c0_5, %c0_6] : memref<2x8x31xf32, #tpu.memory_space<vmem>>, vector<1x8x31xf32>
    %22 = vector.shape_cast %21 : vector<1x8x31xf32> to vector<8x31xf32>
    %c0_7 = arith.constant 0 : index
    %c2 = arith.constant 2 : index
    %23 = vector.load %arg6[%c0_7, %c2] : memref<8x70xf32, #tpu.memory_space<vmem>>, vector<8x31xf32>
    tpu.vector_store %arg6[%c0_7, %c2], %22 {strides = array<i32>} : memref<8x70xf32, #tpu.memory_space<vmem>>, vector<8x31xf32>,
    %c1 = arith.constant 1 : index
    %c0_8 = arith.constant 0 : index
    %c0_9 = arith.constant 0 : index
    %24 = vector.load %arg1[%c1, %c0_8, %c0_9] : memref<2x8x31xf32, #tpu.memory_space<vmem>>, vector<1x8x31xf32>
    %25 = vector.shape_cast %24 : vector<1x8x31xf32> to vector<8x31xf32>
    %c0_10 = arith.constant 0 : index
    %c37 = arith.constant 37 : index
    %26 = vector.load %arg6[%c0_10, %c37] : memref<8x70xf32, #tpu.memory_space<vmem>>, vector<8x31xf32>
    tpu.vector_store %arg6[%c0_10, %c37], %25 {strides = array<i32>} : memref<8x70xf32, #tpu.memory_space<vmem>>, vector<8x31xf32>,
    %c0_11 = arith.constant 0 : index
    %c0_12 = arith.constant 0 : index
    %27 = vector.load %arg4[%c0_11, %c0_12] : memref<8x4xf32, #tpu.memory_space<vmem>>, vector<8x4xf32>
    %28 = vector.extract_strided_slice %27 {offsets = [0, 0], sizes = [8, 1], strides = [1, 1]} : vector<8x4xf32> to vector<8x1xf32>
    %29 = vector.extract_strided_slice %27 {offsets = [0, 1], sizes = [8, 1], strides = [1, 1]} : vector<8x4xf32> to vector<8x1xf32>
    %30 = vector.extract_strided_slice %27 {offsets = [0, 2], sizes = [8, 1], strides = [1, 1]} : vector<8x4xf32> to vector<8x1xf32>
    %31 = vector.extract_strided_slice %27 {offsets = [0, 3], sizes = [8, 1], strides = [1, 1]} : vector<8x4xf32> to vector<8x1xf32>
    %c0_13 = arith.constant 0 : index
    %c0_14 = arith.constant 0 : index
    %c0_15 = arith.constant 0 : index
    %32 = vector.load %arg2[%c0_13, %c0_14, %c0_15] : memref<5x8x8xf32, #tpu.memory_space<vmem>>, vector<1x8x8xf32>
    %33 = vector.shape_cast %32 : vector<1x8x8xf32> to vector<8x8xf32>
    %c0_16 = arith.constant 0 : index
    %c0_17 = arith.constant 0 : index
    %34 = vector.load %arg6[%c0_16, %c0_17] : memref<8x70xf32, #tpu.memory_space<vmem>>, vector<8x66xf32>
    %cst_18 = arith.constant dense<0.000000e+00> : vector<8x66xf32>
    %35 = tpu.matmul %33, %34, %cst_18 {dimension_numbers = #tpu.dot_dimension_numbers<[1], [0], [0], [1], [0, 0, 1, 1], [], []>} : vector<8x8xf32>, vector<8x66xf32>, vector<8x66xf32> -> vector<8x66xf32>
    %c1_19 = arith.constant 1 : index
    %c0_20 = arith.constant 0 : index
    %c0_21 = arith.constant 0 : index
    %36 = vector.load %arg2[%c1_19, %c0_20, %c0_21] : memref<5x8x8xf32, #tpu.memory_space<vmem>>, vector<1x8x8xf32>
    %37 = vector.shape_cast %36 : vector<1x8x8xf32> to vector<8x8xf32>
    %c0_22 = arith.constant 0 : index
    %c1_23 = arith.constant 1 : index
    %38 = vector.load %arg6[%c0_22, %c1_23] : memref<8x70xf32, #tpu.memory_space<vmem>>, vector<8x66xf32>
    %cst_24 = arith.constant dense<0.000000e+00> : vector<8x66xf32>
    %39 = tpu.matmul %37, %38, %cst_24 {dimension_numbers = #tpu.dot_dimension_numbers<[1], [0], [0], [1], [0, 0, 1, 1], [], []>} : vector<8x8xf32>, vector<8x66xf32>, vector<8x66xf32> -> vector<8x66xf32>
    %40 = arith.addf %35, %39 : vector<8x66xf32>
    %c2_25 = arith.constant 2 : index
    %c0_26 = arith.constant 0 : index
    %c0_27 = arith.constant 0 : index
    %41 = vector.load %arg2[%c2_25, %c0_26, %c0_27] : memref<5x8x8xf32, #tpu.memory_space<vmem>>, vector<1x8x8xf32>
    %42 = vector.shape_cast %41 : vector<1x8x8xf32> to vector<8x8xf32>
    %c0_28 = arith.constant 0 : index
    %c2_29 = arith.constant 2 : index
    %43 = vector.load %arg6[%c0_28, %c2_29] : memref<8x70xf32, #tpu.memory_space<vmem>>, vector<8x66xf32>
    %cst_30 = arith.constant dense<0.000000e+00> : vector<8x66xf32>
    %44 = tpu.matmul %42, %43, %cst_30 {dimension_numbers = #tpu.dot_dimension_numbers<[1], [0], [0], [1], [0, 0, 1, 1], [], []>} : vector<8x8xf32>, vector<8x66xf32>, vector<8x66xf32> -> vector<8x66xf32>
    %45 = arith.addf %40, %44 : vector<8x66xf32>
    %c3 = arith.constant 3 : index
    %c0_31 = arith.constant 0 : index
    %c0_32 = arith.constant 0 : index
    %46 = vector.load %arg2[%c3, %c0_31, %c0_32] : memref<5x8x8xf32, #tpu.memory_space<vmem>>, vector<1x8x8xf32>
    %47 = vector.shape_cast %46 : vector<1x8x8xf32> to vector<8x8xf32>
    %c0_33 = arith.constant 0 : index
    %c3_34 = arith.constant 3 : index
    %48 = vector.load %arg6[%c0_33, %c3_34] : memref<8x70xf32, #tpu.memory_space<vmem>>, vector<8x66xf32>
    %cst_35 = arith.constant dense<0.000000e+00> : vector<8x66xf32>
    %49 = tpu.matmul %47, %48, %cst_35 {dimension_numbers = #tpu.dot_dimension_numbers<[1], [0], [0], [1], [0, 0, 1, 1], [], []>} : vector<8x8xf32>, vector<8x66xf32>, vector<8x66xf32> -> vector<8x66xf32>
    %50 = arith.addf %45, %49 : vector<8x66xf32>
    %c4 = arith.constant 4 : index
    %c0_36 = arith.constant 0 : index
    %c0_37 = arith.constant 0 : index
    %51 = vector.load %arg2[%c4, %c0_36, %c0_37] : memref<5x8x8xf32, #tpu.memory_space<vmem>>, vector<1x8x8xf32>
    %52 = vector.shape_cast %51 : vector<1x8x8xf32> to vector<8x8xf32>
    %c0_38 = arith.constant 0 : index
    %c4_39 = arith.constant 4 : index
    %53 = vector.load %arg6[%c0_38, %c4_39] : memref<8x70xf32, #tpu.memory_space<vmem>>, vector<8x66xf32>
    %cst_40 = arith.constant dense<0.000000e+00> : vector<8x66xf32>
    %54 = tpu.matmul %52, %53, %cst_40 {dimension_numbers = #tpu.dot_dimension_numbers<[1], [0], [0], [1], [0, 0, 1, 1], [], []>} : vector<8x8xf32>, vector<8x66xf32>, vector<8x66xf32> -> vector<8x66xf32>
    %55 = arith.addf %50, %54 : vector<8x66xf32>
    %cst_41 = arith.constant 0.000000e+00 : f32
    %56 = vector.broadcast %cst_41 : f32 to vector<8x66xf32>
    %57 = arith.select %18, %55, %56 : vector<8x66xi1>, vector<8x66xf32>
    %c0_42 = arith.constant 0 : index
    %c2_43 = arith.constant 2 : index
    %58 = vector.load %arg6[%c0_42, %c2_43] : memref<8x70xf32, #tpu.memory_space<vmem>>, vector<8x66xf32>
    tpu.vector_store %arg6[%c0_42, %c2_43], %57 {strides = array<i32>} : memref<8x70xf32, #tpu.memory_space<vmem>>, vector<8x66xf32>,
    %c0_44 = arith.constant 0 : index
    %c0_45 = arith.constant 0 : index
    %c0_46 = arith.constant 0 : index
    %59 = vector.load %arg3[%c0_44, %c0_45, %c0_46] : memref<10x8x8xf32, #tpu.memory_space<vmem>>, vector<1x8x8xf32>
    %60 = vector.shape_cast %59 : vector<1x8x8xf32> to vector<8x8xf32>
    %c0_47 = arith.constant 0 : index
    %c0_48 = arith.constant 0 : index
    %61 = vector.load %arg6[%c0_47, %c0_48] : memref<8x70xf32, #tpu.memory_space<vmem>>, vector<8x66xf32>
    %cst_49 = arith.constant dense<0.000000e+00> : vector<8x66xf32>
    %62 = tpu.matmul %60, %61, %cst_49 {dimension_numbers = #tpu.dot_dimension_numbers<[1], [0], [0], [1], [0, 0, 1, 1], [], []>} : vector<8x8xf32>, vector<8x66xf32>, vector<8x66xf32> -> vector<8x66xf32>
    %c1_50 = arith.constant 1 : index
    %c0_51 = arith.constant 0 : index
    %c0_52 = arith.constant 0 : index
    %63 = vector.load %arg3[%c1_50, %c0_51, %c0_52] : memref<10x8x8xf32, #tpu.memory_space<vmem>>, vector<1x8x8xf32>
    %64 = vector.shape_cast %63 : vector<1x8x8xf32> to vector<8x8xf32>
    %c0_53 = arith.constant 0 : index
    %c1_54 = arith.constant 1 : index
    %65 = vector.load %arg6[%c0_53, %c1_54] : memref<8x70xf32, #tpu.memory_space<vmem>>, vector<8x66xf32>
    %cst_55 = arith.constant dense<0.000000e+00> : vector<8x66xf32>
    %66 = tpu.matmul %64, %65, %cst_55 {dimension_numbers = #tpu.dot_dimension_numbers<[1], [0], [0], [1], [0, 0, 1, 1], [], []>} : vector<8x8xf32>, vector<8x66xf32>, vector<8x66xf32> -> vector<8x66xf32>
    %67 = arith.addf %62, %66 : vector<8x66xf32>
    %c2_56 = arith.constant 2 : index
    %c0_57 = arith.constant 0 : index
    %c0_58 = arith.constant 0 : index
    %68 = vector.load %arg3[%c2_56, %c0_57, %c0_58] : memref<10x8x8xf32, #tpu.memory_space<vmem>>, vector<1x8x8xf32>
    %69 = vector.shape_cast %68 : vector<1x8x8xf32> to vector<8x8xf32>
    %c0_59 = arith.constant 0 : index
    %c2_60 = arith.constant 2 : index
    %70 = vector.load %arg6[%c0_59, %c2_60] : memref<8x70xf32, #tpu.memory_space<vmem>>, vector<8x66xf32>
    %cst_61 = arith.constant dense<0.000000e+00> : vector<8x66xf32>
    %71 = tpu.matmul %69, %70, %cst_61 {dimension_numbers = #tpu.dot_dimension_numbers<[1], [0], [0], [1], [0, 0, 1, 1], [], []>} : vector<8x8xf32>, vector<8x66xf32>, vector<8x66xf32> -> vector<8x66xf32>
    %72 = arith.addf %67, %71 : vector<8x66xf32>
    %c3_62 = arith.constant 3 : index
    %c0_63 = arith.constant 0 : index
    %c0_64 = arith.constant 0 : index
    %73 = vector.load %arg3[%c3_62, %c0_63, %c0_64] : memref<10x8x8xf32, #tpu.memory_space<vmem>>, vector<1x8x8xf32>
    %74 = vector.shape_cast %73 : vector<1x8x8xf32> to vector<8x8xf32>
    %c0_65 = arith.constant 0 : index
    %c3_66 = arith.constant 3 : index
    %75 = vector.load %arg6[%c0_65, %c3_66] : memref<8x70xf32, #tpu.memory_space<vmem>>, vector<8x66xf32>
    %cst_67 = arith.constant dense<0.000000e+00> : vector<8x66xf32>
    %76 = tpu.matmul %74, %75, %cst_67 {dimension_numbers = #tpu.dot_dimension_numbers<[1], [0], [0], [1], [0, 0, 1, 1], [], []>} : vector<8x8xf32>, vector<8x66xf32>, vector<8x66xf32> -> vector<8x66xf32>
    %77 = arith.addf %72, %76 : vector<8x66xf32>
    %c4_68 = arith.constant 4 : index
    %c0_69 = arith.constant 0 : index
    %c0_70 = arith.constant 0 : index
    %78 = vector.load %arg3[%c4_68, %c0_69, %c0_70] : memref<10x8x8xf32, #tpu.memory_space<vmem>>, vector<1x8x8xf32>
    %79 = vector.shape_cast %78 : vector<1x8x8xf32> to vector<8x8xf32>
    %c0_71 = arith.constant 0 : index
    %c4_72 = arith.constant 4 : index
    %80 = vector.load %arg6[%c0_71, %c4_72] : memref<8x70xf32, #tpu.memory_space<vmem>>, vector<8x66xf32>
    %cst_73 = arith.constant dense<0.000000e+00> : vector<8x66xf32>
    %81 = tpu.matmul %79, %80, %cst_73 {dimension_numbers = #tpu.dot_dimension_numbers<[1], [0], [0], [1], [0, 0, 1, 1], [], []>} : vector<8x8xf32>, vector<8x66xf32>, vector<8x66xf32> -> vector<8x66xf32>
    %82 = arith.addf %77, %81 : vector<8x66xf32>
    %cst_74 = arith.constant 0.000000e+00 : f32
    %83 = vector.broadcast %cst_74 : f32 to vector<8x66xf32>
    %84 = arith.select %18, %82, %83 : vector<8x66xi1>, vector<8x66xf32>
    %cst_75 = arith.constant dense<0.000000e+00> : vector<8xf32>
    %85 = vector.multi_reduction <add>, %84, %cst_75 [1] : vector<8x66xf32> to vector<8xf32>
    %86 = vector.shape_cast %85 : vector<8xf32> to vector<8x1xf32>
    %87 = arith.mulf %84, %84 : vector<8x66xf32>
    %cst_76 = arith.constant dense<0.000000e+00> : vector<8xf32>
    %88 = vector.multi_reduction <add>, %87, %cst_76 [1] : vector<8x66xf32> to vector<8xf32>
    %89 = vector.shape_cast %88 : vector<8xf32> to vector<8x1xf32>
    %cst_77 = arith.constant 0.0161290318 : f32
    %90 = vector.broadcast %cst_77 : f32 to vector<8x1xf32>
    %91 = arith.mulf %86, %90 : vector<8x1xf32>
    %cst_78 = arith.constant 0.0161290318 : f32
    %92 = vector.broadcast %cst_78 : f32 to vector<8x1xf32>
    %93 = arith.mulf %89, %92 : vector<8x1xf32>
    %94 = arith.mulf %91, %91 : vector<8x1xf32>
    %95 = arith.subf %93, %94 : vector<8x1xf32>
    %cst_79 = arith.constant 9.99999974E-6 : f32
    %96 = vector.broadcast %cst_79 : f32 to vector<8x1xf32>
    %97 = arith.addf %95, %96 : vector<8x1xf32>
    %98 = math.rsqrt %97 : vector<8x1xf32>
    %99 = arith.mulf %28, %98 : vector<8x1xf32>
    %100 = arith.mulf %91, %99 : vector<8x1xf32>
    %101 = arith.subf %29, %100 : vector<8x1xf32>
    %102 = vector.broadcast %99 : vector<8x1xf32> to vector<8x66xf32>
    %103 = arith.mulf %82, %102 : vector<8x66xf32>
    %104 = vector.broadcast %101 : vector<8x1xf32> to vector<8x66xf32>
    %105 = arith.addf %103, %104 : vector<8x66xf32>
    %cst_80 = arith.constant 0.000000e+00 : f32
    %106 = vector.broadcast %cst_80 : f32 to vector<8x66xf32>
    %107 = arith.maximumf %105, %106 : vector<8x66xf32>
    %cst_81 = arith.constant 0.000000e+00 : f32
    %108 = vector.broadcast %cst_81 : f32 to vector<8x66xf32>
    %109 = arith.select %18, %107, %108 : vector<8x66xi1>, vector<8x66xf32>
    %c0_82 = arith.constant 0 : index
    %c2_83 = arith.constant 2 : index
    %110 = vector.load %arg6[%c0_82, %c2_83] : memref<8x70xf32, #tpu.memory_space<vmem>>, vector<8x66xf32>
    tpu.vector_store %arg6[%c0_82, %c2_83], %109 {strides = array<i32>} : memref<8x70xf32, #tpu.memory_space<vmem>>, vector<8x66xf32>,
    %c5 = arith.constant 5 : index
    %c0_84 = arith.constant 0 : index
    %c0_85 = arith.constant 0 : index
    %111 = vector.load %arg3[%c5, %c0_84, %c0_85] : memref<10x8x8xf32, #tpu.memory_space<vmem>>, vector<1x8x8xf32>
    %112 = vector.shape_cast %111 : vector<1x8x8xf32> to vector<8x8xf32>
    %c0_86 = arith.constant 0 : index
    %c0_87 = arith.constant 0 : index
    %113 = vector.load %arg6[%c0_86, %c0_87] : memref<8x70xf32, #tpu.memory_space<vmem>>, vector<8x66xf32>
    %cst_88 = arith.constant dense<0.000000e+00> : vector<8x66xf32>
    %114 = tpu.matmul %112, %113, %cst_88 {dimension_numbers = #tpu.dot_dimension_numbers<[1], [0], [0], [1], [0, 0, 1, 1], [], []>} : vector<8x8xf32>, vector<8x66xf32>, vector<8x66xf32> -> vector<8x66xf32>
    %c6 = arith.constant 6 : index
    %c0_89 = arith.constant 0 : index
    %c0_90 = arith.constant 0 : index
    %115 = vector.load %arg3[%c6, %c0_89, %c0_90] : memref<10x8x8xf32, #tpu.memory_space<vmem>>, vector<1x8x8xf32>
    %116 = vector.shape_cast %115 : vector<1x8x8xf32> to vector<8x8xf32>
    %c0_91 = arith.constant 0 : index
    %c1_92 = arith.constant 1 : index
    %117 = vector.load %arg6[%c0_91, %c1_92] : memref<8x70xf32, #tpu.memory_space<vmem>>, vector<8x66xf32>
    %cst_93 = arith.constant dense<0.000000e+00> : vector<8x66xf32>
    %118 = tpu.matmul %116, %117, %cst_93 {dimension_numbers = #tpu.dot_dimension_numbers<[1], [0], [0], [1], [0, 0, 1, 1], [], []>} : vector<8x8xf32>, vector<8x66xf32>, vector<8x66xf32> -> vector<8x66xf32>
    %119 = arith.addf %114, %118 : vector<8x66xf32>
    %c7 = arith.constant 7 : index
    %c0_94 = arith.constant 0 : index
    %c0_95 = arith.constant 0 : index
    %120 = vector.load %arg3[%c7, %c0_94, %c0_95] : memref<10x8x8xf32, #tpu.memory_space<vmem>>, vector<1x8x8xf32>
    %121 = vector.shape_cast %120 : vector<1x8x8xf32> to vector<8x8xf32>
    %c0_96 = arith.constant 0 : index
    %c2_97 = arith.constant 2 : index
    %122 = vector.load %arg6[%c0_96, %c2_97] : memref<8x70xf32, #tpu.memory_space<vmem>>, vector<8x66xf32>
    %cst_98 = arith.constant dense<0.000000e+00> : vector<8x66xf32>
    %123 = tpu.matmul %121, %122, %cst_98 {dimension_numbers = #tpu.dot_dimension_numbers<[1], [0], [0], [1], [0, 0, 1, 1], [], []>} : vector<8x8xf32>, vector<8x66xf32>, vector<8x66xf32> -> vector<8x66xf32>
    %124 = arith.addf %119, %123 : vector<8x66xf32>
    %c8 = arith.constant 8 : index
    %c0_99 = arith.constant 0 : index
    %c0_100 = arith.constant 0 : index
    %125 = vector.load %arg3[%c8, %c0_99, %c0_100] : memref<10x8x8xf32, #tpu.memory_space<vmem>>, vector<1x8x8xf32>
    %126 = vector.shape_cast %125 : vector<1x8x8xf32> to vector<8x8xf32>
    %c0_101 = arith.constant 0 : index
    %c3_102 = arith.constant 3 : index
    %127 = vector.load %arg6[%c0_101, %c3_102] : memref<8x70xf32, #tpu.memory_space<vmem>>, vector<8x66xf32>
    %cst_103 = arith.constant dense<0.000000e+00> : vector<8x66xf32>
    %128 = tpu.matmul %126, %127, %cst_103 {dimension_numbers = #tpu.dot_dimension_numbers<[1], [0], [0], [1], [0, 0, 1, 1], [], []>} : vector<8x8xf32>, vector<8x66xf32>, vector<8x66xf32> -> vector<8x66xf32>
    %129 = arith.addf %124, %128 : vector<8x66xf32>
    %c9 = arith.constant 9 : index
    %c0_104 = arith.constant 0 : index
    %c0_105 = arith.constant 0 : index
    %130 = vector.load %arg3[%c9, %c0_104, %c0_105] : memref<10x8x8xf32, #tpu.memory_space<vmem>>, vector<1x8x8xf32>
    %131 = vector.shape_cast %130 : vector<1x8x8xf32> to vector<8x8xf32>
    %c0_106 = arith.constant 0 : index
    %c4_107 = arith.constant 4 : index
    %132 = vector.load %arg6[%c0_106, %c4_107] : memref<8x70xf32, #tpu.memory_space<vmem>>, vector<8x66xf32>
    %cst_108 = arith.constant dense<0.000000e+00> : vector<8x66xf32>
    %133 = tpu.matmul %131, %132, %cst_108 {dimension_numbers = #tpu.dot_dimension_numbers<[1], [0], [0], [1], [0, 0, 1, 1], [], []>} : vector<8x8xf32>, vector<8x66xf32>, vector<8x66xf32> -> vector<8x66xf32>
    %134 = arith.addf %129, %133 : vector<8x66xf32>
    %cst_109 = arith.constant 0.000000e+00 : f32
    %135 = vector.broadcast %cst_109 : f32 to vector<8x66xf32>
    %136 = arith.select %18, %134, %135 : vector<8x66xi1>, vector<8x66xf32>
    %cst_110 = arith.constant dense<0.000000e+00> : vector<8xf32>
    %137 = vector.multi_reduction <add>, %136, %cst_110 [1] : vector<8x66xf32> to vector<8xf32>
    %138 = vector.shape_cast %137 : vector<8xf32> to vector<8x1xf32>
    %139 = arith.mulf %136, %136 : vector<8x66xf32>
    %cst_111 = arith.constant dense<0.000000e+00> : vector<8xf32>
    %140 = vector.multi_reduction <add>, %139, %cst_111 [1] : vector<8x66xf32> to vector<8xf32>
    %141 = vector.shape_cast %140 : vector<8xf32> to vector<8x1xf32>
    %cst_112 = arith.constant 0.0161290318 : f32
    %142 = vector.broadcast %cst_112 : f32 to vector<8x1xf32>
    %143 = arith.mulf %138, %142 : vector<8x1xf32>
    %cst_113 = arith.constant 0.0161290318 : f32
    %144 = vector.broadcast %cst_113 : f32 to vector<8x1xf32>
    %145 = arith.mulf %141, %144 : vector<8x1xf32>
    %146 = arith.mulf %143, %143 : vector<8x1xf32>
    %147 = arith.subf %145, %146 : vector<8x1xf32>
    %cst_114 = arith.constant 9.99999974E-6 : f32
    %148 = vector.broadcast %cst_114 : f32 to vector<8x1xf32>
    %149 = arith.addf %147, %148 : vector<8x1xf32>
    %150 = math.rsqrt %149 : vector<8x1xf32>
    %151 = arith.mulf %30, %150 : vector<8x1xf32>
    %152 = arith.mulf %143, %151 : vector<8x1xf32>
    %153 = arith.subf %31, %152 : vector<8x1xf32>
    %154 = vector.broadcast %151 : vector<8x1xf32> to vector<8x66xf32>
    %155 = arith.mulf %134, %154 : vector<8x66xf32>
    %156 = vector.broadcast %153 : vector<8x1xf32> to vector<8x66xf32>
    %157 = arith.addf %155, %156 : vector<8x66xf32>
    %cst_115 = arith.constant 0.000000e+00 : f32
    %158 = vector.broadcast %cst_115 : f32 to vector<8x66xf32>
    %159 = arith.maximumf %157, %158 : vector<8x66xf32>
    %c0_116 = arith.constant 0 : index
    %c0_117 = arith.constant 0 : index
    %160 = vector.load %arg5[%c0_116, %c0_117] : memref<8x66xf32, #tpu.memory_space<vmem>>, vector<8x66xf32>
    tpu.vector_store %arg5[%c0_116, %c0_117], %159 {strides = array<i32>} : memref<8x66xf32, #tpu.memory_space<vmem>>, vector<8x66xf32>,
    return
  }
  func.func @transform_0(%arg0: i32) -> (i32, i32, i32) {
    %c0_i32 = arith.constant 0 : i32
    %c0_i32_0 = arith.constant 0 : i32
    %c0_i32_1 = arith.constant 0 : i32
    %c0_i32_2 = arith.constant 0 : i32
    return %c0_i32, %c0_i32_0, %c0_i32_1 : i32, i32, i32
  }
  func.func @transform_1(%arg0: i32) -> (i32, i32, i32) {
    %c0_i32 = arith.constant 0 : i32
    %c0_i32_0 = arith.constant 0 : i32
    %c0_i32_1 = arith.constant 0 : i32
    %c0_i32_2 = arith.constant 0 : i32
    return %c0_i32, %c0_i32_0, %c0_i32_1 : i32, i32, i32
  }
  func.func @transform_2(%arg0: i32) -> (i32, i32, i32) {
    %c0_i32 = arith.constant 0 : i32
    %c0_i32_0 = arith.constant 0 : i32
    %c0_i32_1 = arith.constant 0 : i32
    %c0_i32_2 = arith.constant 0 : i32
    return %c0_i32, %c0_i32_0, %c0_i32_1 : i32, i32, i32
  }
  func.func @transform_3(%arg0: i32) -> (i32, i32) {
    %c0_i32 = arith.constant 0 : i32
    %c0_i32_0 = arith.constant 0 : i32
    %c0_i32_1 = arith.constant 0 : i32
    return %c0_i32, %c0_i32_0 : i32, i32
  }
  func.func @transform_4(%arg0: i32) -> (i32, i32) {
    %c0_i32 = arith.constant 0 : i32
    %c0_i32_0 = arith.constant 0 : i32
    %c0_i32_1 = arith.constant 0 : i32
    return %c0_i32, %c0_i32_0 : i32, i32
  }
}

</mosaic_0001>

<bundles_post_ra>
// kernel: decoder_block_forward.1
= control target key start
LH: loop header
LB: loop body
LE: loop exit
PB: predicated region body
PF: predicated region fallthrough
CT: control target
= control target key end

     0   :  { %vm39_vm0 = vcmask 572416   ;;  %v1477_v1 = vmov 0.0   ;;  %s1478_s17 = smov 2   ;;  %s1479_s20 = smov 37   ;;  %vm1480_vm1 = vmmov 0   ;;  %vm46_vm2 = vcmask 269328   ;;  %s1679_s0 = inlined_call_operand.vmem [shape: f32[2,8,31], index: 0, kind: input, shape index: {}]   ;;  %s1680_s1 = inlined_call_operand.vmem [shape: f32[5,8,8], index: 1, kind: input, shape index: {}]   ;;  %s1681_s2 = inlined_call_operand.vmem [shape: f32[10,8,8], index: 2, kind: input, shape index: {}]   ;;  %s1682_s3 = inlined_call_operand.vmem [shape: f32[8,4], index: 3, kind: input, shape index: {}]   ;;  %s1683_s4 = inlined_call_operand.vmem [shape: f32[8,66], index: 4, kind: output, shape index: {}]  }
   0x1   :  { %v41_v0 = vld [vmem:[%s1679_s0] sm:$0xff]  ;;  %40 = vst.msk [vmem:[#allocation2] sm:$0xff] %vm39_vm0, %v1477_v1  ;;  %1383 = vmatprep.subr.mxu1 %v1477_v1  ;;  %1378 = vmatprep.subr.mxu0 %v1477_v1  ;;  %v1319_v2 = vld [vmem:[%s1679_s0 + $0x8] sm:$0xff]  ;;  %vm54_vm3 = vcmask 556328   ;;  %vm65_vm4 = vcmask 64512   ;;  %s1481_s0 = smov 125   ;;  %v17_v18 = vlaneseq }
   0x2   :  { %43 = vrot.lane.b32.xlu0 %v41_v0, %s1478_s17  ;;  %1385 = vmatprep.mubr.msk.f32.mxu1 %vm1480_vm1, %v1477_v1  ;;  %v57_v6 = vld [vmem:[%s1680_s1] sm:$0xff]  ;;  %s1482_s23 = smov 127   ;;  %s1483_s24 = smov 126   ;;  %v1320_v7 = vld [vmem:[%s1680_s1 + $0x8] sm:$0xff]  ;;  %v1325_v10 = vld [vmem:[%s1680_s1 + $0x18] sm:$0xff]  ;;  %v1485_v15 = vmov 0  }
   0x3   :  { %1380 = vmatprep.mubr.msk.f32.mxu0 %vm1480_vm1, %v1477_v1  ;;  %s1484_s25 = smov 124   ;;  %v1323_v11 = vld [vmem:[%s1680_s1 + $0x10] sm:$0xff]  ;;  %v1327_v13 = vld [vmem:[%s1680_s1 + $0x20] sm:$0xff]  ;;  %1468 = vset.pattern.permute.xlu1 %v1485_v15  ;;  %v18_v19 = vand.u32 127, %v17_v18  ;;  %vm454_vm10 = vcmask 556048   ;;  %v1329_v46 = vld [vmem:[%s1681_s2 + $0x8] sm:$0xff] }
   0x4   :  { %v456_v45 = vld [vmem:[%s1681_s2] sm:$0xff]  ;;  %v1332_v49 = vld [vmem:[%s1681_s2 + $0x10] sm:$0xff]  ;;  %v1334_v50 = vld [vmem:[%s1681_s2 + $0x18] sm:$0xff]  ;;  %vm848_vm11 = vcmask 539648  }
   0x5   :  { %v1568_v20 = vmul.u32.u64.low 3926827242, %v18_v19  ;;  %v1569_v21 = vmul.u32.u64.high 3926827242, %v18_v19, %v1568_v20  ;;  %v1336_v53 = vld [vmem:[%s1681_s2 + $0x20] sm:$0xff] }
   0x6   :  { %51 = vrot.lane.b32.xlu0 %v1319_v2, %s1479_s20  ;;  %s1486_s20 = smov 1  }
   0x7   :  { %vm25_vm5 = vc.u32 %v1568_v20, 3926827242  ;;  %v1487_v20 = vmov 1  }
   0x8   :  { %v26_v22 = vsel %vm25_vm5, 1, %v1485_v15 }
   0x9   :  { %v27_v23 = vadd.s32 %v1569_v21, %v26_v22 }
   0xb   :  { %v28_v24 = vshrl.u32 %v27_v23, 5 }
   0xd   :  { %v29_v25 = vmul.u32 35, %v28_v24 }
   0xf   :  { %v30_v26 = vsub.s32 %v18_v19, %v29_v25 }
  0x11   :  { %vm33_vm6 = vcmp.ne.s32.totalorder %v30_v26, 0  ;;  %vm34_vm7 = vcmp.lt.s32.totalorder %v30_v26, 0  ;;  %v36_v29 = vadd.s32 35, %v30_v26 }
  0x12   :  { %vm35_vm8 = vmand %vm34_vm7, %vm33_vm6 }
  0x13   :  { %v37_v35 = vsel %vm35_vm8, %v36_v29, %v30_v26 }
  0x14   :  { %vm1572_vm9 = vcmp.lt.s32.totalorder %v37_v35, 31  ;;  %v1342_v35 = vld [vmem:[%s1681_s2 + $0x38] sm:$0xff] }
  0x74   :  { %v44_v3 = vpop.permute.xlu0 %43 }
  0x75   :  { %47 = vst.msk [vmem:[#allocation2] sm:$0xff] %vm46_vm2, %v44_v3 }
  0x78   :  { %v52_v4 = vpop.permute.xlu0 %51 }
  0x79   :  { %55 = vst.msk [vmem:[#allocation2] sm:$0xff] %vm54_vm3, %v52_v4 }
  0x80   :  { %v58_v5 = vld [vmem:[#allocation2] sm:$0xff] }
  0x81   :  { %293 = vrot.lane.b32.xlu0 %v58_v5, %s1481_s0  ;;  %62 = vrot.lane.b32.xlu1 %v58_v5, %s1482_s23 }
  0x82   :  { %1384 = vmatpush3.msra.mxu1 %v58_v5 }
  0x83   :  { %1393 = vmatprep.subr.mxu1 %v1477_v1  ;;  %1386 = vmatmul.mubr.msk.f32.vlgmr.msra.gmra.mxu1 %vm65_vm4, %v57_v6 }
  0x84   :  { %1395 = vmatprep.mubr.msk.f32.mxu1 %vm1480_vm1, %v1477_v1 }
  0x85   :  { %214 = vrot.lane.b32.xlu1 %v58_v5, %s1483_s24 }
  0x89   :  { %372 = vrot.lane.b32.xlu1 %v58_v5, %s1484_s25 }
  0xf3   :  { %v294_v8 = vpop.permute.xlu0 %293  ;;  %v63_v9 = vpop.permute.xlu1 %62 }
  0xf4   :  { %1379 = vmatpush3.msra.mxu0 %v63_v9  ;;  %1394 = vmatpush3.msra.mxu1 %v294_v8 }
  0xf5   :  { %1381 = vmatmul.mubr.msk.f32.vlgmr.msra.gmra.mxu0 %vm65_vm4, %v1320_v7  ;;  %1388 = vmatprep.subr.mxu0 %v1477_v1 }
  0xf6   :  { %1390 = vmatprep.mubr.msk.f32.mxu0 %vm1480_vm1, %v1477_v1  ;;  %1396 = vmatmul.mubr.msk.f32.vlgmr.msra.gmra.mxu1 %vm65_vm4, %v1325_v10 }
  0xf7   :  { %v215_v12 = vpop.permute.xlu1 %214  ;;  %1403 = vmatprep.subr.mxu1 %v1477_v1  ;;  %1405 = vmatprep.mubr.msk.f32.mxu1 %vm1480_vm1, %v1477_v1 }
  0xf8   :  { %1389 = vmatpush3.msra.mxu0 %v215_v12 }
  0xf9   :  { %1391 = vmatmul.mubr.msk.f32.vlgmr.msra.gmra.mxu0 %vm65_vm4, %v1323_v11  ;;  %1398 = vmatprep.subr.mxu0 %v1477_v1 }
  0xfa   :  { %1400 = vmatprep.mubr.msk.f32.mxu0 %vm1480_vm1, %v1477_v1 }
  0xfb   :  { %v373_v14 = vpop.permute.xlu1 %372 }
  0xfc   :  { %1399 = vmatpush3.msra.mxu0 %v373_v14 }
  0xfd   :  { %1401 = vmatmul.mubr.msk.f32.vlgmr.msra.gmra.mxu0 %vm65_vm4, %v1327_v13  ;;  %1408 = vmatprep.subr.mxu0 %v1477_v1 }
  0xfe   :  { %1410 = vmatprep.mubr.msk.f32.mxu0 %vm1480_vm1, %v1477_v1 }
 0x143   :  { %v208_v16 = vpop.f32.mrf.mxu1 }
 0x145   :  { %v1387_v17 = vpop.f32.mrf.mxu1 }
 0x1b5   :  { %v135_v27 = vpop.f32.mrf.mxu0 }
 0x1b6   :  { %v365_v28 = vpop.f32.mrf.mxu1  ;;  %v209_v31 = vadd.f32 %v208_v16, %v135_v27  ;;  %v1626_v16 = vld [vmem:[%s1682_s3] sm:$0xff] }
 0x1b7   :  { %v1382_v30 = vpop.f32.mrf.mxu0 }
 0x1b8   :  { %v1397_v32 = vpop.f32.mrf.mxu1 }
 0x1b9   :  { %v286_v33 = vpop.f32.mrf.mxu0  ;;  %v1339_v32 = vld [vmem:[%s1681_s2 + $0x30] sm:$0xff] }
 0x1ba   :  { %v290_v34 = vadd.f32 %v286_v33, %v209_v31  ;;  %v1338_v31 = vld [vmem:[%s1681_s2 + $0x28] sm:$0xff] }
 0x1bb   :  { %v1392_v36 = vpop.f32.mrf.mxu0 }
 0x1bc   :  { %v369_v37 = vadd.f32 %v365_v28, %v290_v34  ;;  %v1344_v36 = vld [vmem:[%s1681_s2 + $0x40] sm:$0xff] }
 0x1bd   :  { %v444_v38 = vpop.f32.mrf.mxu0 }
 0x1be   :  { %v448_v40 = vadd.f32 %v444_v38, %v369_v37 }
 0x1bf   :  { %v1402_v41 = vpop.f32.mrf.mxu0 }
 0x1c0   :  { %v449_v42 = vsel %vm1572_vm9, %v448_v40, 0.0  ;;  %v1346_v40 = vld [vmem:[%s1681_s2 + $0x48] sm:$0xff] }
 0x1c1   :  { %451 = vrot.lane.b32.xlu0 %v449_v42, %s1478_s17 }
 0x233   :  { %v452_v43 = vpop.permute.xlu0 %451 }
 0x234   :  { %455 = vst.msk [vmem:[#allocation2] sm:$0xff] %vm454_vm10, %v452_v43 }
 0x23b   :  { %v457_v44 = vld [vmem:[#allocation2] sm:$0xff] }
 0x23c   :  { %612 = vrot.lane.b32.xlu0 %v457_v44, %s1483_s24  ;;  %461 = vrot.lane.b32.xlu1 %v457_v44, %s1482_s23 }
 0x23d   :  { %1409 = vmatpush3.msra.mxu0 %v457_v44 }
 0x23e   :  { %1411 = vmatmul.mubr.msk.f32.vlgmr.msra.gmra.mxu0 %vm65_vm4, %v456_v45  ;;  %1418 = vmatprep.subr.mxu0 %v1477_v1 }
 0x23f   :  { %1420 = vmatprep.mubr.msk.f32.mxu0 %vm1480_vm1, %v1477_v1 }
 0x240   :  { %770 = vrot.lane.b32.xlu0 %v457_v44, %s1484_s25  ;;  %691 = vrot.lane.b32.xlu1 %v457_v44, %s1481_s0 }
 0x2ae   :  { %v613_v47 = vpop.permute.xlu0 %612  ;;  %v462_v48 = vpop.permute.xlu1 %461 }
 0x2af   :  { %1404 = vmatpush3.msra.mxu1 %v462_v48 }
 0x2b0   :  { %1406 = vmatmul.mubr.msk.f32.vlgmr.msra.gmra.mxu1 %vm65_vm4, %v1329_v46  ;;  %1413 = vmatprep.subr.mxu1 %v1477_v1 }
 0x2b1   :  { %1414 = vmatpush3.msra.mxu1 %v613_v47  ;;  %1415 = vmatprep.mubr.msk.f32.mxu1 %vm1480_vm1, %v1477_v1 }
 0x2b2   :  { %v771_v51 = vpop.permute.xlu0 %770  ;;  %v692_v52 = vpop.permute.xlu1 %691  ;;  %1423 = vmatprep.subr.mxu1 %v1477_v1 }
 0x2b3   :  { %1419 = vmatpush3.msra.mxu0 %v692_v52 }
 0x2b4   :  { %1416 = vmatmul.mubr.msk.f32.vlgmr.msra.gmra.mxu1 %vm65_vm4, %v1332_v49  ;;  %1421 = vmatmul.mubr.msk.f32.vlgmr.msra.gmra.mxu0 %vm65_vm4, %v1334_v50 }
 0x2b5   :  { %1424 = vmatpush3.msra.mxu1 %v771_v51  ;;  %1425 = vmatprep.mubr.msk.f32.mxu1 %vm1480_vm1, %v1477_v1 }
 0x2b6   :  { %1433 = vmatprep.subr.mxu1 %v1477_v1  ;;  %1428 = vmatprep.subr.mxu0 %v1477_v1 }
 0x2b7   :  { %1430 = vmatprep.mubr.msk.f32.mxu0 %vm1480_vm1, %v1477_v1 }
 0x2b8   :  { %1426 = vmatmul.mubr.msk.f32.vlgmr.msra.gmra.mxu1 %vm65_vm4, %v1336_v53 }
 0x2b9   :  { %1435 = vmatprep.mubr.msk.f32.mxu1 %vm1480_vm1, %v1477_v1 }
 0x2fe   :  { %v606_v54 = vpop.f32.mrf.mxu0 }
 0x300   :  { %v1412_v55 = vpop.f32.mrf.mxu0 }
 0x370   :  { %v533_v56 = vpop.f32.mrf.mxu1 }
 0x371   :  { %v607_v58 = vadd.f32 %v606_v54, %v533_v56 }
 0x372   :  { %v1407_v57 = vpop.f32.mrf.mxu1 }
 0x374   :  { %v684_v59 = vpop.f32.mrf.mxu1  ;;  %v763_v60 = vpop.f32.mrf.mxu0 }
 0x375   :  { %v688_v61 = vadd.f32 %v684_v59, %v607_v58  ;;  %v1488_v58 = vmov 2  }
 0x376   :  { %v1417_v62 = vpop.f32.mrf.mxu1  ;;  %v1422_v63 = vpop.f32.mrf.mxu0 }
 0x377   :  { %v767_v0 = vadd.f32 %v763_v60, %v688_v61 }
 0x378   :  { %v842_v2 = vpop.f32.mrf.mxu1 }
 0x379   :  { %v846_v3 = vadd.f32 %v842_v2, %v767_v0 }
 0x37a   :  { %v1427_v4 = vpop.f32.mrf.mxu1 }
 0x37b   :  { %v847_v5 = vsel %vm1572_vm9, %v846_v3, 0.0 }
 0x37c   :  { %v849_v6 = vsel %vm848_vm11, %v847_v5, 0.0  ;;  %v852_v7 = vmul.f32 %v847_v5, %v847_v5 }
 0x37d   :  { %850 = vadd.xlane.f32.xlu1 %v849_v6 }
 0x37e   :  { %v853_v8 = vsel %vm848_vm11, %v852_v7, 0.0 }
 0x37f   :  { %854 = vadd.xlane.f32.xlu0 %v853_v8 }
 0x406   :  { %v851_v9 = vpop.xlane.xlu1 %850 }
 0x407   :  { %v856_v10 = vmul.f32 0.016129032, %v851_v9 }
 0x408   :  { %v855_v11 = vpop.xlane.xlu0 %854 }
 0x409   :  { %v858_v12 = vmul.f32 %v856_v10, %v856_v10  ;;  %v857_v13 = vmul.f32 0.016129032, %v855_v11 }
 0x40b   :  { %v859_v14 = vsub.f32 %v857_v13, %v858_v12 }
 0x40d   :  { %v860_v15 = vadd.f32 1e-05, %v859_v14 }
 0x40f   :  { %1473 = vrsqrt.f32 %v860_v15 }
 0x41c   :  { %v1474_v17 = vpop.eup %1473 }
 0x41d   :  { %v862_v18 = vmul.f32 %v1474_v17, %v1626_v16 }
 0x41f   :  { %871 = vperm.xlu1 %1468, %v862_v18   ;;  %v863_v19 = vmul.f32 %v862_v18, %v856_v10 }
 0x421   :  { %865 = vrot.lane.b32.xlu0 %v863_v19, %s1486_s20 }
 0x423   :  { %1469 = vset.pattern.permute.xlu1 %v1487_v20 }
 0x493   :  { %v866_v21 = vpop.permute.xlu0 %865 }
 0x494   :  { %v868_v22 = vsub.f32 %v1626_v16, %v866_v21 }
 0x496   :  { %877 = vperm.xlu1 %1469, %v868_v22  }
 0x49a   :  { %v872_v23 = vpop.permute.xlu1 %871  ;;  %1470 = vset.pattern.permute.xlu1 %v1488_v58 }
 0x49b   :  { %v874_v24 = vmul.f32 %v872_v23, %v846_v3  ;;  %v1489_v3 = vmov 3  }
 0x49c   :  { %1472 = vset.pattern.permute.xlu0 %v1489_v3 }
 0x511   :  { %v878_v25 = vpop.permute.xlu1 %877 }
 0x512   :  { %v880_v26 = vadd.f32 %v878_v25, %v874_v24 }
 0x514   :  { %v881_v27 = vmax.f32 %v880_v26, 0.0 }
 0x516   :  { %v882_v28 = vsel %vm1572_vm9, %v881_v27, 0.0 }
 0x517   :  { %884 = vrot.lane.b32.xlu0 %v882_v28, %s1478_s17 }
 0x589   :  { %v885_v29 = vpop.permute.xlu0 %884 }
 0x58a   :  { %887 = vst.msk [vmem:[#allocation2] sm:$0xff] %vm454_vm10, %v885_v29 }
 0x591   :  { %v890_v30 = vld [vmem:[#allocation2] sm:$0xff] }
 0x592   :  { %1045 = vrot.lane.b32.xlu0 %v890_v30, %s1483_s24  ;;  %894 = vrot.lane.b32.xlu1 %v890_v30, %s1482_s23 }
 0x593   :  { %1434 = vmatpush3.msra.mxu1 %v890_v30 }
 0x594   :  { %1436 = vmatmul.mubr.msk.f32.vlgmr.msra.gmra.mxu1 %vm65_vm4, %v1338_v31  ;;  %1443 = vmatprep.subr.mxu1 %v1477_v1 }
 0x595   :  { %1445 = vmatprep.mubr.msk.f32.mxu1 %vm1480_vm1, %v1477_v1 }
 0x596   :  { %1203 = vrot.lane.b32.xlu0 %v890_v30, %s1484_s25  ;;  %1124 = vrot.lane.b32.xlu1 %v890_v30, %s1481_s0 }
 0x604   :  { %v1046_v33 = vpop.permute.xlu0 %1045  ;;  %v895_v34 = vpop.permute.xlu1 %894 }
 0x605   :  { %1429 = vmatpush3.msra.mxu0 %v895_v34 }
 0x606   :  { %1431 = vmatmul.mubr.msk.f32.vlgmr.msra.gmra.mxu0 %vm65_vm4, %v1339_v32  ;;  %1438 = vmatprep.subr.mxu0 %v1477_v1 }
 0x607   :  { %1439 = vmatpush3.msra.mxu0 %v1046_v33  ;;  %1440 = vmatprep.mubr.msk.f32.mxu0 %vm1480_vm1, %v1477_v1 }
 0x608   :  { %v1204_v37 = vpop.permute.xlu0 %1203  ;;  %v1125_v38 = vpop.permute.xlu1 %1124  ;;  %1448 = vmatprep.subr.mxu0 %v1477_v1 }
 0x609   :  { %1444 = vmatpush3.msra.mxu1 %v1125_v38 }
 0x60a   :  { %1441 = vmatmul.mubr.msk.f32.vlgmr.msra.gmra.mxu0 %vm65_vm4, %v1342_v35  ;;  %1446 = vmatmul.mubr.msk.f32.vlgmr.msra.gmra.mxu1 %vm65_vm4, %v1344_v36 }
 0x60b   :  { %1449 = vmatpush3.msra.mxu0 %v1204_v37  ;;  %1450 = vmatprep.mubr.msk.f32.mxu0 %vm1480_vm1, %v1477_v1 }
 0x60e   :  { %1451 = vmatmul.mubr.msk.f32.vlgmr.msra.gmra.mxu0 %vm65_vm4, %v1346_v40 }
 0x654   :  { %v1039_v41 = vpop.f32.mrf.mxu1 }
 0x656   :  { %v1437_v42 = vpop.f32.mrf.mxu1 }
 0x6c6   :  { %v966_v43 = vpop.f32.mrf.mxu0 }
 0x6c7   :  { %v1040_v45 = vadd.f32 %v1039_v41, %v966_v43 }
 0x6c8   :  { %v1432_v44 = vpop.f32.mrf.mxu0 }
 0x6ca   :  { %v1117_v46 = vpop.f32.mrf.mxu0  ;;  %v1196_v47 = vpop.f32.mrf.mxu1 }
 0x6cb   :  { %v1121_v48 = vadd.f32 %v1117_v46, %v1040_v45 }
 0x6cc   :  { %v1442_v49 = vpop.f32.mrf.mxu0  ;;  %v1447_v50 = vpop.f32.mrf.mxu1 }
 0x6cd   :  { %v1200_v51 = vadd.f32 %v1196_v47, %v1121_v48 }
 0x6ce   :  { %v1275_v52 = vpop.f32.mrf.mxu0 }
 0x6cf   :  { %v1279_v53 = vadd.f32 %v1275_v52, %v1200_v51 }
 0x6d0   :  { %v1452_v1 = vpop.f32.mrf.mxu0 }
 0x6d1   :  { %v1280_v54 = vsel %vm1572_vm9, %v1279_v53, 0.0 }
 0x6d2   :  { %v1281_v55 = vsel %vm848_vm11, %v1280_v54, 0.0  ;;  %v1284_v56 = vmul.f32 %v1280_v54, %v1280_v54 }
 0x6d3   :  { %1282 = vadd.xlane.f32.xlu1 %v1281_v55 }
 0x6d4   :  { %v1285_v57 = vsel %vm848_vm11, %v1284_v56, 0.0 }
 0x6d5   :  { %1286 = vadd.xlane.f32.xlu0 %v1285_v57 }
 0x75c   :  { %v1283_v59 = vpop.xlane.xlu1 %1282 }
 0x75d   :  { %v1288_v60 = vmul.f32 0.016129032, %v1283_v59 }
 0x75e   :  { %v1287_v61 = vpop.xlane.xlu0 %1286 }
 0x75f   :  { %v1290_v62 = vmul.f32 %v1288_v60, %v1288_v60  ;;  %v1289_v63 = vmul.f32 0.016129032, %v1287_v61 }
 0x761   :  { %v1291_v0 = vsub.f32 %v1289_v63, %v1290_v62 }
 0x763   :  { %v1292_v2 = vadd.f32 1e-05, %v1291_v0 }
 0x765   :  { %1475 = vrsqrt.f32 %v1292_v2 }
 0x772   :  { %v1476_v39 = vpop.eup %1475 }
 0x773   :  { %v1294_v4 = vmul.f32 %v1476_v39, %v1626_v16 }
 0x775   :  { %1303 = vperm.xlu1 %1470, %v1294_v4   ;;  %v1295_v5 = vmul.f32 %v1294_v4, %v1288_v60 }
 0x777   :  { %1297 = vrot.lane.b32.xlu0 %v1295_v5, %s1486_s20 }
 0x779   :  { %1471 = vset.pattern.permute.xlu1 %v1489_v3 }
 0x7e9   :  { %v1298_v6 = vpop.permute.xlu0 %1297 }
 0x7ea   :  { %v1300_v7 = vsub.f32 %v1626_v16, %v1298_v6 }
 0x7ec   :  { %1309 = vperm.xlu1 %1471, %v1300_v7  }
 0x7f0   :  { %v1304_v8 = vpop.permute.xlu1 %1303 }
 0x7f1   :  { %v1306_v9 = vmul.f32 %v1304_v8, %v1279_v53 }
 0x867   :  { %v1310_v10 = vpop.permute.xlu1 %1309 }
 0x868   :  { %v1312_v11 = vadd.f32 %v1310_v10, %v1306_v9 }
 0x86a   :  { %v1313_v12 = vmax.f32 %v1312_v11, 0.0 }
 0x86c   :  { %1314 = vst.msk [vmem:[%s1683_s4] sm:$0xff] %vm848_vm11, %v1313_v12 }

</bundles_post_ra>
